<compile_context>
chip_gen: v6e
topology: v6e:2x2x1
jax: 0.10.0
libtpu: 0.0.40
codegen_flags: <defaults>
</compile_context>

<pallas_src>
import functools

import jax
import jax.numpy as jnp
from jax.experimental import pallas as pl
from jax.experimental.pallas import tpu as pltpu


_LANE_COLS = 1024        # lane-dense last dim (multiple of 128)
_MAX_BLOCK_ROWS = 512    # 512 x 1024 f32 = 2 MiB / block -> 8 MiB double-buffered


def _round_up(a, b):
    return (a + b - 1) // b * b


def _lambda_kernel(x_ref, o_ref, *, func):
    """Elementwise hot path: load tile, apply func on the VPU/EUP, store."""
    # Upcast to f32 for the math (v5e has no bf16 VPU/EUP datapath); cast back
    # to the output dtype so HBM writeback stays at the input precision.
    x = x_ref[...].astype(jnp.float32)
    o_ref[...] = func(x).astype(o_ref.dtype)


def pallas_lambda(x, func, *, min_pallas_elems=0):
    """Apply `func` elementwise to `x` via a tiled, pipelined Pallas TPU kernel.

    `min_pallas_elems` lets callers short-circuit tiny inputs to plain XLA
    (kernel launch + DMA fixed cost dwarfs the work); default 0 so the Pallas
    path always runs here.
    """
    if x.size < min_pallas_elems:
        return func(x.astype(jnp.float32)).astype(x.dtype)

    orig_shape = x.shape
    n = x.size

    # Sublane granularity: 8 rows for 4-byte dtypes, 16 for 2-byte (packed).
    itemsize = jnp.dtype(x.dtype).itemsize
    sublane = 8 * max(1, 4 // itemsize)

    cols = _LANE_COLS
    rows = pl.cdiv(n, cols)
    block_rows = min(_MAX_BLOCK_ROWS, _round_up(rows, sublane))
    rows_padded = _round_up(rows, block_rows)
    n_padded = rows_padded * cols

    # Flatten + pad to a lane-dense 2-D slab; padding is sliced off afterwards.
    x_flat = jnp.ravel(x)
    if n_padded != n:
        x_flat = jnp.pad(x_flat, (0, n_padded - n))
    x2d = x_flat.reshape(rows_padded, cols)

    grid = (rows_padded // block_rows,)
    kernel = functools.partial(_lambda_kernel, func=func)

    out2d = pl.pallas_call(
        kernel,
        out_shape=jax.ShapeDtypeStruct((rows_padded, cols), x.dtype),
        grid=grid,
        in_specs=[pl.BlockSpec((block_rows, cols), lambda i: (i, 0))],
        out_specs=pl.BlockSpec((block_rows, cols), lambda i: (i, 0)),
        compiler_params=pltpu.CompilerParams(
            dimension_semantics=("parallel",),     # megacore split on v7x
            vmem_limit_bytes=32 * 1024 * 1024,     # explicit headroom (v7x: 64 MiB phys)
        ),
    )(x2d)

    return out2d.reshape(-1)[:n].reshape(orig_shape)


class Lambda:
    """JAX/Pallas analogue of the PyTorch `Lambda(func)` module."""

    def __init__(self, func):
        self.func = func

    def __call__(self, x):
        return pallas_lambda(x, self.func)


def softplus_func(x):
    """Numerically stable softplus: max(x,0) + log1p(exp(-|x|)).

    Matches torch.nn.functional.softplus (beta=1, threshold=20) to within f32
    rounding, with only one exp + one log1p per element (single EUP pipe).
    """
    return jnp.maximum(x, 0.0) + jnp.log1p(jnp.exp(-jnp.abs(x)))


# TODO(synk): `Lambda` wraps an arbitrary user-provided callable; only
# elementwise / jnp-traceable callables are supported inside the kernel here.


if __name__ == "__main__":
    key = jax.random.PRNGKey(0)
    batch, hidden = 2, 32
    x = jax.random.normal(key, (batch, hidden), dtype=jnp.float32) * 5.0

    layer = Lambda(softplus_func)
    out = jax.block_until_ready(layer(x))

    # Reference check against plain JAX (same semantics as torch softplus).
    ref = jax.block_until_ready(softplus_func(x))
    assert out.shape == x.shape and out.dtype == x.dtype
    assert jnp.allclose(out, ref, atol=1e-6, rtol=1e-6)
    assert jnp.allclose(out, jax.nn.softplus(x), atol=1e-5, rtol=1e-5)

    print("KERNEL_OK")
</pallas_src>

<mosaic_0001>
module attributes {stable_mosaic.version = 11 : i64} {
  func.func @_lambda_kernel(%arg0: i32, %arg1: memref<8x1024xf32, #tpu.memory_space<vmem>>, %arg2: memref<8x1024xf32, #tpu.memory_space<vmem>>) attributes {dimension_semantics = [#tpu.dimension_semantics<parallel>], iteration_bounds = array<i64: 1>, scalar_prefetch = 0 : i64, scratch_operands = 0 : i64, tpu.core_type = #tpu.core_type<tc>, window_params = [{transform_indices = @transform_0, window_bounds = array<i64: 8, 1024>}, {transform_indices = @transform_1, window_bounds = array<i64: 8, 1024>}]} {
    %c0 = arith.constant 0 : index
    %c0_0 = arith.constant 0 : index
    %0 = vector.load %arg1[%c0, %c0_0] : memref<8x1024xf32, #tpu.memory_space<vmem>>, vector<8x1024xf32>
    %cst = arith.constant 0.000000e+00 : f32
    %1 = vector.broadcast %cst : f32 to vector<8x1024xf32>
    %2 = arith.maximumf %0, %1 : vector<8x1024xf32>
    %3 = math.absf %0 : vector<8x1024xf32>
    %cst_1 = arith.constant 0.000000e+00 : f32
    %4 = vector.broadcast %cst_1 : f32 to vector<8x1024xf32>
    %5 = arith.subf %4, %3 : vector<8x1024xf32>
    %6 = math.exp %5 : vector<8x1024xf32>
    %7 = math.log1p %6 : vector<8x1024xf32>
    %8 = arith.addf %2, %7 : vector<8x1024xf32>
    %c0_2 = arith.constant 0 : index
    %c0_3 = arith.constant 0 : index
    %9 = vector.load %arg2[%c0_2, %c0_3] : memref<8x1024xf32, #tpu.memory_space<vmem>>, vector<8x1024xf32>
    tpu.vector_store %arg2[%c0_2, %c0_3], %8 {strides = array<i32>} : memref<8x1024xf32, #tpu.memory_space<vmem>>, vector<8x1024xf32>,
    return
  }
  func.func @transform_0(%arg0: i32) -> (i32, i32) {
    %c0_i32 = arith.constant 0 : i32
    %c0_i32_0 = arith.constant 0 : i32
    return %arg0, %c0_i32 : i32, i32
  }
  func.func @transform_1(%arg0: i32) -> (i32, i32) {
    %c0_i32 = arith.constant 0 : i32
    %c0_i32_0 = arith.constant 0 : i32
    return %arg0, %c0_i32 : i32, i32
  }
}

</mosaic_0001>

<bundles_post_ra>
// kernel: tpu_custom_call.1
= control target key start
LH: loop header
LB: loop body
LE: loop exit
PB: predicated region body
PF: predicated region fallthrough
CT: control target
= control target key end

     0   :  { %6 = vsyncpa [#allocation3], 0  ;;  %s360_s0 = inlined_call_operand.hbm [shape: f32[8,1024], index: 0, kind: input, shape index: {}]   ;;  %s361_s1 = inlined_call_operand.hbm [shape: f32[8,1024], index: 1, kind: output, shape index: {}]  }
   0x1   :  { %7 = vsyncpa [#allocation4], 0  ;;  %s250_s6 = smov [#allocation2]  }
   0x2   :  { %s14_s7 = sshll.u32 %s250_s6, 4  ;;  %s15_s7 = int_to_ptr.vmem [resolvable:$true] %s14_s7 }
   0x3   :  { %s214_s8 = scalar_lea.vmem %s15_s7, 1024  ;;  %p219_p1 = scmp.lt.s32.totalorder %s15_s7, %s15_s7 }
   0x4   :  { %p215_p0 = scmp.ne.s32.totalorder %s15_s7, %s214_s8  ;;  %p220_p2 = scmp.lt.s32.totalorder %s214_s8, %s214_s8 }
   0x6   :  { %p221_p3 = por %p220_p2, %p219_p1 }
   0x8   :  { %p222_p4 = pnand %p221_p3, %p215_p0 }
   0xa   :  { %225 = shalt.err (!%p222_p4)
}
   0xb   :  { %17 = dma.hbm_to_vmem [thread:$0]  %s360_s0, 1024, %s15_s7, [#allocation3]  }
   0xc   :  { %246 = dma.done.wait [#allocation3], 1024  }
   0xd   :  { %247 = vsyncadd [#allocation3], 4294966272  ;;  %v265_v0 = vld [vmem:[#allocation2] sm:$0xff]  ;;  %v267_v1 = vld [vmem:[#allocation2 + $0x8] sm:$0xff]  ;;  %s251_s0 = smov [#allocation5]  }
   0xe   :  { %v269_v2 = vld [vmem:[#allocation2 + $0x10] sm:$0xff]  ;;  %v37_v3 = vand.u32 2147483647, %v265_v0  ;;  %v38_v4 = vand.u32 2147483647, %v267_v1  ;;  %v274_v6 = vld [vmem:[#allocation2 + $0x18] sm:$0xff] }
   0xf   :  { %v39_v5 = vand.u32 2147483647, %v269_v2  ;;  %v276_v7 = vld [vmem:[#allocation2 + $0x20] sm:$0xff]  ;;  %v40_v10 = vand.u32 2147483647, %v274_v6  ;;  %v279_v11 = vld [vmem:[#allocation2 + $0x28] sm:$0xff] }
  0x10   :  { %v45_v8 = vsub.f32 0.0, %v37_v3  ;;  %v46_v9 = vsub.f32 0.0, %v38_v4  ;;  %v41_v13 = vand.u32 2147483647, %v276_v7  ;;  %v282_v14 = vld [vmem:[#allocation2 + $0x30] sm:$0xff]  ;;  %v284_v15 = vld [vmem:[#allocation2 + $0x38] sm:$0xff] }
  0x11   :  { %v47_v12 = vsub.f32 0.0, %v39_v5  ;;  %v48_v18 = vsub.f32 0.0, %v40_v10  ;;  %v42_v21 = vand.u32 2147483647, %v279_v11  ;;  %v43_v23 = vand.u32 2147483647, %v282_v14 }
  0x12   :  { %v53_v16 = vmul.f32 1.442695, %v45_v8  ;;  %v55_v17 = vmul.f32 1.442695, %v46_v9  ;;  %v49_v20 = vsub.f32 0.0, %v41_v13  ;;  %v29_v57 = vmax.f32 %v265_v0, 0.0 }
  0x13   :  { %v57_v19 = vmul.f32 1.442695, %v47_v12  ;;  %v59_v22 = vmul.f32 1.442695, %v48_v18  ;;  %v44_v24 = vand.u32 2147483647, %v284_v15 }
  0x14   :  { %174 = vpow2.f32 %v53_v16  ;;  %v61_v25 = vmul.f32 1.442695, %v49_v20  ;;  %v50_v26 = vsub.f32 0.0, %v42_v21  ;;  %v51_v27 = vsub.f32 0.0, %v43_v23  ;;  %s163_s11 = sshll.u32 %s251_s0, 4  ;;  %s164_s11 = int_to_ptr.vmem [resolvable:$true] %s163_s11 }
  0x15   :  { %176 = vpow2.f32 %v55_v17  ;;  %v52_v28 = vsub.f32 0.0, %v44_v24  ;;  %v30_v61 = vmax.f32 %v267_v1, 0.0  ;;  %v31_v62 = vmax.f32 %v269_v2, 0.0  ;;  %s226_s12 = scalar_lea.vmem %s164_s11, 1024  ;;  %p231_p6 = scmp.lt.s32.totalorder %s164_s11, %s164_s11 }
  0x16   :  { %178 = vpow2.f32 %v57_v19  ;;  %v63_v29 = vmul.f32 1.442695, %v50_v26  ;;  %v65_v30 = vmul.f32 1.442695, %v51_v27  ;;  %v32_v5 = vmax.f32 %v274_v6, 0.0  ;;  %p227_p5 = scmp.ne.s32.totalorder %s164_s11, %s226_s12  ;;  %p232_p7 = scmp.lt.s32.totalorder %s226_s12, %s226_s12 }
  0x17   :  { %180 = vpow2.f32 %v59_v22  ;;  %v67_v31 = vmul.f32 1.442695, %v52_v28 }
  0x18   :  { %182 = vpow2.f32 %v61_v25  ;;  %p233_p8 = por %p232_p7, %p231_p6 }
  0x19   :  { %184 = vpow2.f32 %v63_v29 }
  0x1a   :  { %186 = vpow2.f32 %v65_v30  ;;  %p234_p9 = pnand %p233_p8, %p227_p5 }
  0x1b   :  { %188 = vpow2.f32 %v67_v31 }
  0x21   :  { %v175_v32 = vpop.eup %174 }
  0x22   :  { %v177_v33 = vpop.eup %176  ;;  %v69_v34 = vadd.f32 1.0, %v175_v32  ;;  %v72_v43 = vmul.f32 -0.5, %v175_v32  ;;  %v75_v52 = vand.u32 2147483647, %v175_v32 }
  0x23   :  { %v179_v35 = vpop.eup %178  ;;  %v78_v36 = vadd.f32 1.0, %v177_v33  ;;  %v81_v45 = vmul.f32 -0.5, %v177_v33  ;;  %v84_v53 = vand.u32 2147483647, %v177_v33 }
  0x24   :  { %v181_v37 = vpop.eup %180  ;;  %190 = vlog2.f32 %v69_v34  ;;  %v87_v38 = vadd.f32 1.0, %v179_v35  ;;  %v90_v47 = vmul.f32 -0.5, %v179_v35  ;;  %v73_v51 = vadd.f32 1.0, %v72_v43 }
  0x25   :  { %v289_v39 = vpop.eup %182  ;;  %192 = vlog2.f32 %v78_v36  ;;  %v96_v40 = vadd.f32 1.0, %v181_v37  ;;  %v99_v49 = vmul.f32 -0.5, %v181_v37  ;;  %v82_v54 = vadd.f32 1.0, %v81_v45 }
  0x26   :  { %194 = vlog2.f32 %v87_v38  ;;  %v291_v41 = vpop.eup %184  ;;  %v105_v44 = vadd.f32 1.0, %v289_v39  ;;  %v108_v55 = vmul.f32 -0.5, %v289_v39  ;;  %v91_v58 = vadd.f32 1.0, %v90_v47 }
  0x27   :  { %v293_v42 = vpop.eup %186  ;;  %196 = vlog2.f32 %v96_v40  ;;  %v114_v48 = vadd.f32 1.0, %v291_v41  ;;  %v93_v59 = vand.u32 2147483647, %v179_v35  ;;  %v102_v60 = vand.u32 2147483647, %v181_v37 }
  0x28   :  { %v296_v46 = vpop.eup %188  ;;  %198 = vlog2.f32 %v105_v44  ;;  %v123_v50 = vadd.f32 1.0, %v293_v42  ;;  %v100_v63 = vadd.f32 1.0, %v99_v49  ;;  %v74_v3 = vmul.f32 %v175_v32, %v73_v51 }
  0x29   :  { %200 = vlog2.f32 %v114_v48  ;;  %v132_v56 = vadd.f32 1.0, %v296_v46  ;;  %vm305_vm0 = vcmp.lt.f32.partialorder %v75_v52, 0.0004427343  ;;  %v117_v8 = vmul.f32 -0.5, %v291_v41 }
  0x2a   :  { %202 = vlog2.f32 %v123_v50  ;;  %v83_v0 = vmul.f32 %v177_v33, %v82_v54  ;;  %vm311_vm1 = vcmp.lt.f32.partialorder %v84_v53, 0.0004427343  ;;  %v109_v1 = vadd.f32 1.0, %v108_v55 }
  0x2b   :  { %204 = vlog2.f32 %v132_v56  ;;  %v126_v2 = vmul.f32 -0.5, %v293_v42  ;;  %v92_v16 = vmul.f32 %v179_v35, %v91_v58  ;;  %vm316_vm2 = vcmp.lt.f32.partialorder %v93_v59, 0.0004427343 }
  0x2c   :  { %vm320_vm3 = vcmp.lt.f32.partialorder %v102_v60, 0.0004427343  ;;  %v101_v20 = vmul.f32 %v181_v37, %v100_v63  ;;  %v111_v21 = vand.u32 2147483647, %v289_v39  ;;  %v135_v22 = vmul.f32 -0.5, %v296_v46 }
  0x2d   :  { %v118_v25 = vadd.f32 1.0, %v117_v8  ;;  %v120_v26 = vand.u32 2147483647, %v291_v41  ;;  %v110_v30 = vmul.f32 %v289_v39, %v109_v1  ;;  %v127_v31 = vadd.f32 1.0, %v126_v2 }
  0x2e   :  { %v129_v35 = vand.u32 2147483647, %v293_v42  ;;  %v33_v38 = vmax.f32 %v276_v7, 0.0  ;;  %vm336_vm4 = vcmp.lt.f32.partialorder %v111_v21, 0.0004427343  ;;  %v136_v43 = vadd.f32 1.0, %v135_v22 }
  0x2f   :  { %v119_v45 = vmul.f32 %v291_v41, %v118_v25  ;;  %v138_v47 = vand.u32 2147483647, %v296_v46  ;;  %v34_v50 = vmax.f32 %v279_v11, 0.0  ;;  %vm345_vm5 = vcmp.lt.f32.partialorder %v120_v26, 0.0004427343 }
  0x30   :  { %v128_v51 = vmul.f32 %v293_v42, %v127_v31  ;;  %v35_v41 = vmax.f32 %v282_v14, 0.0  ;;  %vm130_vm6 = vcmp.lt.f32.partialorder %v129_v35, 0.0004427343  ;;  %v36_v59 = vmax.f32 %v284_v15, 0.0 }
  0x31   :  { %v191_v9 = vpop.eup %190  ;;  %vm139_vm7 = vcmp.lt.f32.partialorder %v138_v47, 0.0004427343 }
  0x32   :  { %v193_v12 = vpop.eup %192  ;;  %v71_v13 = vmul.f32 0.6931472, %v191_v9 }
  0x33   :  { %v195_v18 = vpop.eup %194  ;;  %v80_v19 = vmul.f32 0.6931472, %v193_v12 }
  0x34   :  { %v77_v23 = vsel %vm305_vm0, %v74_v3, %v71_v13  ;;  %v89_v24 = vmul.f32 0.6931472, %v195_v18  ;;  %v197_v27 = vpop.eup %196 }
  0x35   :  { %v141_v28 = vadd.f32 %v77_v23, %v29_v57  ;;  %v86_v29 = vsel %vm311_vm1, %v83_v0, %v80_v19  ;;  %v98_v34 = vmul.f32 0.6931472, %v197_v27  ;;  %v199_v36 = vpop.eup %198  ;;  %v137_v57 = vmul.f32 %v296_v46, %v136_v43 }
  0x36   :  { %v142_v32 = vadd.f32 %v86_v29, %v30_v61  ;;  %v95_v33 = vsel %vm316_vm2, %v92_v16, %v89_v24  ;;  %v107_v44 = vmul.f32 0.6931472, %v199_v36  ;;  %v201_v48 = vpop.eup %200 }
  0x37   :  { %149 = vst [vmem:[#allocation5] sm:$0xff] %v141_v28  ;;  %v143_v37 = vadd.f32 %v95_v33, %v31_v62  ;;  %v104_v39 = vsel %vm320_vm3, %v101_v20, %v98_v34  ;;  %v203_v52 = vpop.eup %202  ;;  %v116_v54 = vmul.f32 0.6931472, %v201_v48 }
  0x38   :  { %150 = vst [vmem:[#allocation5 + $0x8] sm:$0xff] %v142_v32  ;;  %v144_v49 = vadd.f32 %v104_v39, %v32_v5  ;;  %v113_v53 = vsel %vm336_vm4, %v110_v30, %v107_v44  ;;  %v125_v56 = vmul.f32 0.6931472, %v203_v52  ;;  %v205_v11 = vpop.eup %204 }
  0x39   :  { %151 = vst [vmem:[#allocation5 + $0x10] sm:$0xff] %v143_v37  ;;  %v145_v55 = vadd.f32 %v113_v53, %v33_v38  ;;  %v122_v58 = vsel %vm345_vm5, %v119_v45, %v116_v54  ;;  %v134_v61 = vmul.f32 0.6931472, %v205_v11 }
  0x3a   :  { %152 = vst [vmem:[#allocation5 + $0x18] sm:$0xff] %v144_v49  ;;  %v146_v42 = vadd.f32 %v122_v58, %v34_v50  ;;  %v131_v60 = vsel %vm130_vm6, %v128_v51, %v125_v56 }
  0x3b   :  { %153 = vst [vmem:[#allocation5 + $0x20] sm:$0xff] %v145_v55  ;;  %v147_v14 = vadd.f32 %v131_v60, %v35_v41  ;;  %v140_v62 = vsel %vm139_vm7, %v137_v57, %v134_v61 }
  0x3c   :  { %154 = vst [vmem:[#allocation5 + $0x28] sm:$0xff] %v146_v42  ;;  %v148_v63 = vadd.f32 %v140_v62, %v36_v59 }
  0x3d   :  { %155 = vst [vmem:[#allocation5 + $0x30] sm:$0xff] %v147_v14 }
  0x3e   :  { %156 = vst [vmem:[#allocation5 + $0x38] sm:$0xff] %v148_v63 }
  0x3f   :  { %237 = shalt.err (!%p234_p9)
}
  0x40   :  { %166 = dma.vmem_to_hbm [thread:$0]  %s164_s11, 1024, %s361_s1, [#allocation4]  }
  0x41   :  { %248 = dma.done.wait [#allocation4], 1024  }
  0x42   :  { %249 = vsyncadd [#allocation4], 4294966272 }
  0x43   :  { %170 = vsyncpa [#allocation3], 1 }
  0x44   :  { %171 = vsyncpa [#allocation4], 1 }

</bundles_post_ra>
